<compile_context>
chip_gen: v6e
topology: v6e:2x2x1
jax: 0.10.0
libtpu: 0.0.40
codegen_flags: <defaults>
</compile_context>

<pallas_src>
import functools

import jax
import jax.numpy as jnp
from jax.experimental import pallas as pl
from jax.experimental.pallas import tpu as pltpu


def _round_up(n, m):
    return ((n + m - 1) // m) * m


def _asym_conv_fused_kernel(x_ref, w2_ref, ws_ref, b2_ref, alpha_ref, o_ref):
    # x_ref:     (C_in, TILE)   f32 spatial tile
    # w2_ref:    (C_out, C_in)  f32 conv2 weight (resident)
    # ws_ref:    (C_out, C_in)  f32 shortcut 1x1-conv weight (resident)
    # b2_ref:    (C_out, 1)     f32 conv2 bias (resident)
    # alpha_ref: (1, 1)         f32 PReLU slope (SMEM scalar)
    # o_ref:     (C_out, TILE)  f32 output tile
    x = x_ref[...]
    conv = jnp.dot(w2_ref[...], x, preferred_element_type=jnp.float32) + b2_ref[...]
    alpha = alpha_ref[0, 0]
    conv = jnp.maximum(conv, 0.0) + alpha * jnp.minimum(conv, 0.0)      # PReLU
    sc = jnp.dot(ws_ref[...], x, preferred_element_type=jnp.float32)    # shortcut conv
    o_ref[...] = (conv + sc).astype(o_ref.dtype)


def _asym_conv_identity_kernel(x_ref, w2_ref, b2_ref, alpha_ref, o_ref):
    # Identity-shortcut specialization (in_cha == out_cha): residual add uses the
    # original f32 x (no second matmul, no rounding of the shortcut path).
    x = x_ref[...]
    conv = jnp.dot(w2_ref[...], x, preferred_element_type=jnp.float32) + b2_ref[...]
    alpha = alpha_ref[0, 0]
    conv = jnp.maximum(conv, 0.0) + alpha * jnp.minimum(conv, 0.0)
    o_ref[...] = (conv + x.astype(jnp.float32)).astype(o_ref.dtype)


@functools.partial(jax.jit, static_argnames=("tile",))
def asymmetric_convolution(x, w2, b2, ws, alpha, *, tile=4096):
    """x: (C_in, H, W) float32 -> (C_out, H, W) float32.

    ws is None for the identity shortcut (in_cha == out_cha), else a (C_out, C_in)
    bias-free 1x1-conv weight.
    """
    c_in, h, w = x.shape
    c_out = w2.shape[0]
    hw = h * w

    lane = 128
    # Large lane-dense tiles (big DMA chunks, few grid steps), but capped so the
    # spatial grid keeps >= 2 steps where possible (v7x megacore parallel split).
    half = -(-hw // 2)
    tile_eff = min(tile, max(lane, _round_up(half, lane)))
    grid = pl.cdiv(hw, tile_eff)

    x2 = x.reshape(c_in, hw)                                   # free reshape, no copy pass
    b2_col = b2.astype(jnp.float32).reshape(c_out, 1)
    alpha2 = jnp.asarray(alpha, jnp.float32).reshape(1, 1)

    identity = ws is None

    x_spec = pl.BlockSpec((c_in, tile_eff), lambda i: (0, i))
    w_spec = pl.BlockSpec((c_out, c_in), lambda i: (0, 0))
    b_spec = pl.BlockSpec((c_out, 1), lambda i: (0, 0))
    a_spec = pl.BlockSpec(memory_space=pltpu.MemorySpace.SMEM)  # PReLU slope via scalar path
    o_spec = pl.BlockSpec((c_out, tile_eff), lambda i: (0, i))

    if identity:
        kernel = _asym_conv_identity_kernel
        in_specs = [x_spec, w_spec, b_spec, a_spec]
        args = (x2, w2.astype(jnp.float32), b2_col, alpha2)
    else:
        kernel = _asym_conv_fused_kernel
        in_specs = [x_spec, w_spec, w_spec, b_spec, a_spec]
        args = (x2, w2.astype(jnp.float32), ws.astype(jnp.float32), b2_col, alpha2)

    out2 = pl.pallas_call(
        kernel,
        out_shape=jax.ShapeDtypeStruct((c_out, hw), jnp.float32),
        grid_spec=pltpu.PrefetchScalarGridSpec(
            num_scalar_prefetch=0,
            grid=(grid,),
            in_specs=in_specs,
            out_specs=o_spec,
        ),
        compiler_params=pltpu.CompilerParams(
            # Spatial tiles are independent -> shard across v7x's 2 TensorCores.
            dimension_semantics=("parallel",),
        ),
    )(*args)

    return out2.reshape(c_out, h, w)


def _reference(x, w2, b2, ws, alpha):
    c_in, h, w = x.shape
    x2 = x.reshape(c_in, h * w)
    y = w2 @ x2 + b2[:, None]
    y = jnp.maximum(y, 0.0) + alpha * jnp.minimum(y, 0.0)
    sc = x2 if ws is None else ws @ x2
    return (y + sc).reshape(w2.shape[0], h, w)


def init_params(key, in_cha, out_cha):
    """Deterministic synthetic parameters matching the PyTorch module's shapes."""
    k1, k2, k3 = jax.random.split(key, 3)
    # conv2: Conv2d(in_cha, out_cha, kernel_size=1) -> weight (out, in, 1, 1), bias (out,)
    bound2 = 1.0 / (in_cha ** 0.5)
    w2 = jax.random.uniform(k1, (out_cha, in_cha), jnp.float32, -bound2, bound2)
    b2 = jax.random.uniform(k2, (out_cha,), jnp.float32, -bound2, bound2)
    # shortcut: identity if in_cha == out_cha else Conv2d(in, out, 1, bias=False)
    if in_cha == out_cha:
        ws = None
    else:
        ws = jax.random.uniform(k3, (out_cha, in_cha), jnp.float32, -bound2, bound2)
    # PReLU: single shared slope, PyTorch default init 0.25
    alpha = jnp.array(0.25, dtype=jnp.float32)
    return w2, b2, ws, alpha


if __name__ == "__main__":
    key = jax.random.PRNGKey(0)

    atol = rtol = 1e-2  # fully f32 path; headroom only for MXU rounding modes

    # Path 1: in_cha != out_cha -> conv2 + shortcut-conv kernel (two MXU dots).
    in_cha, out_cha, H, W = 4, 8, 16, 16
    kx, kp, key = jax.random.split(key, 3)
    x = jax.random.normal(kx, (in_cha, H, W), dtype=jnp.float32)
    w2, b2, ws, alpha = init_params(kp, in_cha, out_cha)
    out = jax.block_until_ready(asymmetric_convolution(x, w2, b2, ws, alpha))
    ref = _reference(x, w2, b2, ws, alpha)
    assert out.shape == (out_cha, H, W)
    assert jnp.allclose(out, ref, atol=atol, rtol=rtol), "mismatch (conv-shortcut path)"

    # Path 2: in_cha == out_cha -> identity-shortcut kernel (residual add of f32 x).
    in_cha2, out_cha2 = 8, 8
    kx2, kp2 = jax.random.split(key)
    x2 = jax.random.normal(kx2, (in_cha2, H, W), dtype=jnp.float32)
    w2b, b2b, wsb, alphab = init_params(kp2, in_cha2, out_cha2)
    out2 = jax.block_until_ready(asymmetric_convolution(x2, w2b, b2b, wsb, alphab))
    ref2 = _reference(x2, w2b, b2b, wsb, alphab)
    assert out2.shape == (out_cha2, H, W)
    assert jnp.allclose(out2, ref2, atol=atol, rtol=rtol), "mismatch (identity path)"

    print("KERNEL_OK")
</pallas_src>

<mosaic_0001>
module attributes {stable_mosaic.version = 11 : i64} {
  func.func @_asym_conv_fused_kernel(%arg0: i32, %arg1: memref<4x128xf32, #tpu.memory_space<vmem>>, %arg2: memref<8x4xf32, #tpu.memory_space<vmem>>, %arg3: memref<8x4xf32, #tpu.memory_space<vmem>>, %arg4: memref<8x1xf32, #tpu.memory_space<vmem>>, %arg5: memref<1x1xf32, #tpu.memory_space<smem>>, %arg6: memref<8x128xf32, #tpu.memory_space<vmem>>) attributes {dimension_semantics = [#tpu.dimension_semantics<parallel>], iteration_bounds = array<i64: 2>, scalar_prefetch = 0 : i64, scratch_operands = 0 : i64, tpu.core_type = #tpu.core_type<tc>, window_params = [{transform_indices = @transform_0, window_bounds = array<i64: 4, 128>}, {pipeline_mode = #tpu.pipeline_mode<synchronous>, transform_indices = @transform_1, window_bounds = array<i64: 8, 4>}, {pipeline_mode = #tpu.pipeline_mode<synchronous>, transform_indices = @transform_2, window_bounds = array<i64: 8, 4>}, {pipeline_mode = #tpu.pipeline_mode<synchronous>, transform_indices = @transform_3, window_bounds = array<i64: 8, 1>}, {transform_indices = @transform_4, window_bounds = array<i64: 1, 1>}, {transform_indices = @transform_5, window_bounds = array<i64: 8, 128>}]} {
    %c0 = arith.constant 0 : index
    %c0_0 = arith.constant 0 : index
    %0 = vector.load %arg1[%c0, %c0_0] : memref<4x128xf32, #tpu.memory_space<vmem>>, vector<4x128xf32>
    %c0_1 = arith.constant 0 : index
    %c0_2 = arith.constant 0 : index
    %1 = vector.load %arg2[%c0_1, %c0_2] : memref<8x4xf32, #tpu.memory_space<vmem>>, vector<8x4xf32>
    %cst = arith.constant dense<0.000000e+00> : vector<8x128xf32>
    %2 = tpu.matmul %1, %0, %cst {dimension_numbers = #tpu.dot_dimension_numbers<[1], [0], [0], [1], [0, 0, 1, 1], [], []>} : vector<8x4xf32>, vector<4x128xf32>, vector<8x128xf32> -> vector<8x128xf32>
    %c0_3 = arith.constant 0 : index
    %c0_4 = arith.constant 0 : index
    %3 = vector.load %arg4[%c0_3, %c0_4] : memref<8x1xf32, #tpu.memory_space<vmem>>, vector<8x1xf32>
    %4 = vector.broadcast %3 : vector<8x1xf32> to vector<8x128xf32>
    %5 = arith.addf %2, %4 : vector<8x128xf32>
    %c0_5 = arith.constant 0 : index
    %c0_6 = arith.constant 0 : index
    %6 = memref.load %arg5[%c0_5, %c0_6] : memref<1x1xf32, #tpu.memory_space<smem>>
    %cst_7 = arith.constant 0.000000e+00 : f32
    %7 = vector.broadcast %cst_7 : f32 to vector<8x128xf32>
    %8 = arith.maximumf %5, %7 : vector<8x128xf32>
    %cst_8 = arith.constant 0.000000e+00 : f32
    %9 = vector.broadcast %cst_8 : f32 to vector<8x128xf32>
    %10 = arith.minimumf %5, %9 : vector<8x128xf32>
    %11 = vector.broadcast %6 : f32 to vector<8x128xf32>
    %12 = arith.mulf %11, %10 : vector<8x128xf32>
    %13 = arith.addf %8, %12 : vector<8x128xf32>
    %c0_9 = arith.constant 0 : index
    %c0_10 = arith.constant 0 : index
    %14 = vector.load %arg3[%c0_9, %c0_10] : memref<8x4xf32, #tpu.memory_space<vmem>>, vector<8x4xf32>
    %cst_11 = arith.constant dense<0.000000e+00> : vector<8x128xf32>
    %15 = tpu.matmul %14, %0, %cst_11 {dimension_numbers = #tpu.dot_dimension_numbers<[1], [0], [0], [1], [0, 0, 1, 1], [], []>} : vector<8x4xf32>, vector<4x128xf32>, vector<8x128xf32> -> vector<8x128xf32>
    %16 = arith.addf %13, %15 : vector<8x128xf32>
    %c0_12 = arith.constant 0 : index
    %c0_13 = arith.constant 0 : index
    %17 = vector.load %arg6[%c0_12, %c0_13] : memref<8x128xf32, #tpu.memory_space<vmem>>, vector<8x128xf32>
    tpu.vector_store %arg6[%c0_12, %c0_13], %16 {strides = array<i32>} : memref<8x128xf32, #tpu.memory_space<vmem>>, vector<8x128xf32>,
    return
  }
  func.func @transform_0(%arg0: i32) -> (i32, i32) {
    %c0_i32 = arith.constant 0 : i32
    %c0_i32_0 = arith.constant 0 : i32
    return %c0_i32, %arg0 : i32, i32
  }
  func.func @transform_1(%arg0: i32) -> (i32, i32) {
    %c0_i32 = arith.constant 0 : i32
    %c0_i32_0 = arith.constant 0 : i32
    %c0_i32_1 = arith.constant 0 : i32
    return %c0_i32, %c0_i32_0 : i32, i32
  }
  func.func @transform_2(%arg0: i32) -> (i32, i32) {
    %c0_i32 = arith.constant 0 : i32
    %c0_i32_0 = arith.constant 0 : i32
    %c0_i32_1 = arith.constant 0 : i32
    return %c0_i32, %c0_i32_0 : i32, i32
  }
  func.func @transform_3(%arg0: i32) -> (i32, i32) {
    %c0_i32 = arith.constant 0 : i32
    %c0_i32_0 = arith.constant 0 : i32
    %c0_i32_1 = arith.constant 0 : i32
    return %c0_i32, %c0_i32_0 : i32, i32
  }
  func.func @transform_4(%arg0: i32) -> (i32, i32) {
    %c0_i32 = arith.constant 0 : i32
    %c0_i32_0 = arith.constant 0 : i32
    %c0_i32_1 = arith.constant 0 : i32
    return %c0_i32, %c0_i32_0 : i32, i32
  }
  func.func @transform_5(%arg0: i32) -> (i32, i32) {
    %c0_i32 = arith.constant 0 : i32
    %c0_i32_0 = arith.constant 0 : i32
    return %c0_i32, %arg0 : i32, i32
  }
}

</mosaic_0001>

<bundles_post_ra>
// kernel: asymmetric_convolution.1
= control target key start
LH: loop header
LB: loop body
LE: loop exit
PB: predicated region body
PF: predicated region fallthrough
CT: control target
= control target key end

     0   :  { %s525_s20 = smov 0   ;;  %s555_s0 = inlined_call_operand.vmem [shape: f32[4,256], index: 0, kind: input, shape index: {}]   ;;  %s556_s1 = inlined_call_operand.vmem [shape: f32[8,4], index: 1, kind: input, shape index: {}]   ;;  %s557_s2 = inlined_call_operand.vmem [shape: f32[8,4], index: 2, kind: input, shape index: {}]   ;;  %s558_s3 = inlined_call_operand.vmem [shape: f32[8,1], index: 3, kind: input, shape index: {}]   ;;  %s559_s4 = inlined_call_operand.<no memory space> [shape: f32[1,1], index: 4, kind: input, shape index: {}]   ;;  %s560_s5 = inlined_call_operand.vmem [shape: f32[8,256], index: 5, kind: output, shape index: {}]  }
   0x1   :  { %10 = sst [smem:[#allocation2]] %s559_s4 }
   0x2 LB: > { %s442_s21 = sadd.s32 4294967295, %s487_s20   ;;  %p446_p0 = scmp.ge.s32.totalorder %s487_s20, 1  ;;  %s487_s20 = sphi %s525_s20, %s16_s20  }
   0x3   : > { %p187_p1 = scmp.lt.s32.totalorder %s487_s20, 3 }
   0x5   : > { %p188_p2 = pnand %p446_p0, %p187_p1 }
   0x6   : > { %p213_p3 = scmp.lt.s32.totalorder (!%p188_p2), %s442_s21, 1  ;;  %s307_s6 = sld [smem:[#allocation2]] (!%p188_p2) }
   0x7   : > { %191 = sbr.rel (%p188_p2) target bundleno = 221 (0xdd), region = 40 }
   0xc   : > { %v489_v0 = vmov 0.0   ;;  %vm490_vm0 = vmmov 0   ;;  %v223_v1 = vld [vmem:[%s558_s3] sm:$0xff]  ;;  %s562_s21 = smov (!%p213_p3, %s442_s21), 1  ;;  %v491_v2 = vmov 0   ;;  %vm233_vm1 = vcmask 1043456  }
   0xd   : > { %459 = vmatprep.subr.mxu0 %v489_v0  ;;  %461 = vmatprep.mubr.msk.f32.mxu0 %vm490_vm0, %v489_v0  ;;  %s447_s23 = sshll.u32 %s562_s21, 2  ;;  %v222_v3 = vld [vmem:[%s556_s1] sm:$0xff]  ;;  %vm229_vm2 = vcmask 31744   ;;  %v310_v11 = vstv %s307_s6  ;;  %s448_s7 = sshll.u32 %s562_s21, 3 }
   0xe   : > { %464 = vmatprep.subr.mxu1 %v489_v0  ;;  %466 = vmatprep.mubr.msk.f32.mxu1 %vm490_vm0, %v489_v0  ;;  %s216_s26 = scalar_lea.vmem %s555_s0, %s447_s23  ;;  %v313_v4 = vld [vmem:[%s557_s2] sm:$0xff]  ;;  %s220_s10 = scalar_lea.vmem %s560_s5, %s448_s7 }
   0xf   : > { %480 = vset.pattern.permute.xlu0 %v491_v2  ;;  %v221_v5 = vld [vmem:[%s216_s26] sm:$0xf] }
  0x10   : > { %226 = vperm.xlu0 %480, %v223_v1   ;;  %460 = vmatpush3.msk.msra.mxu0 %vm233_vm1, %v221_v5 }
  0x11   : > { %465 = vmatpush3.msk.msra.mxu1 %vm233_vm1, %v221_v5  ;;  %462 = vmatmul.mubr.msk.f32.vlgmr.msra.gmra.mxu0 %vm229_vm2, %v222_v3 }
  0x12   : > { %467 = vmatmul.mubr.msk.f32.vlgmr.msra.gmra.mxu1 %vm229_vm2, %v313_v4 }
  0x8b   : > { %v227_v6 = vpop.permute.xlu0 %226 }
  0xd1   : > { %v303_v7 = vpop.f32.mrf.mxu0 }
  0xd2   : > { %v383_v8 = vpop.f32.mrf.mxu1  ;;  %v304_v9 = vadd.f32 %v303_v7, %v227_v6 }
  0xd3   : > { %v463_v10 = vpop.f32.mrf.mxu0 }
  0xd4   : > { %v468_v12 = vpop.f32.mrf.mxu1  ;;  %v309_v13 = vmin.f32 %v304_v9, 0.0  ;;  %v308_v14 = vmax.f32 %v304_v9, 0.0 }
  0xd6   : > { %v311_v15 = vmul.f32 %v310_v11, %v309_v13 }
  0xd8   : > { %v312_v16 = vadd.f32 %v311_v15, %v308_v14 }
  0xda   : > { %v387_v17 = vadd.f32 %v383_v8, %v312_v16 }
  0xdc   : > { %388 = vst [vmem:[%s220_s10] sm:$0xff] %v387_v17 }
  0xdd PF: > { %s16_s20 = sadd.s32 1, %s487_s20  }
  0xde   : > { %p13_p4 = scmp.ge.s32.totalorder %s16_s20, 4  }
  0xe0   :  { %15 = sbr.rel (!%p13_p4) target bundleno = 2 (0x2), region = 70 }

</bundles_post_ra>
